<compile_context>
chip_gen: v7x
topology: tpu7x:2x2x1
jax: 0.10.0
libtpu: 0.0.40
codegen_flags: <defaults>
</compile_context>

<pallas_src>
import functools

import jax
import jax.numpy as jnp
from jax.experimental import pallas as pl
from jax.experimental.pallas import tpu as pltpu

H1, H2 = 20, 10  # hidden sizes of the SAE

_SUBLANE = 16                    # bf16-friendly sublane multiple for batch tiles
_TARGET_TILE_BYTES = 4 << 20     # aim for >= ~4 MiB streamed per grid step
_MIN_GRID_STEPS = 8              # >= 4 pipelined steps per TC on v7x's 2 cores
_MAX_BATCH_TILE = 1024
_VMEM_BLOCK_BUDGET = 40 << 20    # double-buffered in+out blocks (v7x-safe)


def _sigmoid(x):
    # exp on the EUP, approx reciprocal also on the EUP -> VALU stays free.
    return pl.reciprocal(1.0 + jnp.exp(-x), approx=True)


def sae_kernel(x_ref,
               w1_ref, b1_ref,
               w2_ref, b2_ref,
               w3_ref, b3_ref,
               w4_ref, b4_ref,
               out_ref, *, compute_dtype):
    # x arrives in its storage dtype (f32) and is cast to the MXU compute
    # dtype in-register: no separate wrapper-level cast pass over HBM.
    x = x_ref[...].astype(compute_dtype)                                 # (TB, M)

    # fc1 (big, bf16 MXU, f32 accum) + sigmoid epilogue in f32
    z1 = jnp.dot(x, w1_ref[...], preferred_element_type=jnp.float32)     # (TB, 20)
    h1 = _sigmoid(z1 + b1_ref[...])

    # fc2 / fc3 are tiny -> keep fully in f32 (v5e VPU/EUP have no bf16 path)
    h2 = _sigmoid(jnp.dot(h1, w2_ref[...],
                          preferred_element_type=jnp.float32) + b2_ref[...])   # (TB, 10)
    h3 = _sigmoid(jnp.dot(h2, w3_ref[...],
                          preferred_element_type=jnp.float32) + b3_ref[...])   # (TB, 20)

    # fc4 (big, bf16 MXU, f32 accum), no activation; cast on the store.
    y = jnp.dot(h3.astype(w4_ref.dtype), w4_ref[...],
                preferred_element_type=jnp.float32) + b4_ref[...]         # (TB, M)
    out_ref[...] = y.astype(out_ref.dtype)


def prepare_params(params, compute_dtype=jnp.bfloat16):
    """One-time weight prep (call once at init, not per batch): cast the two
    HBM-heavy weights to the MXU compute dtype so the per-batch forward never
    re-streams f32 copies of them."""
    p = dict(params)
    p["w1"] = params["w1"].astype(compute_dtype)
    p["w4"] = params["w4"].astype(compute_dtype)
    return p


def _choose_batch_tile(B, M, in_bytes, out_bytes):
    """Batch-tile rule: large enough to amortize the ~0.35us per-step overhead
    (>= ~4 MiB streamed per tile), small enough to give >= _MIN_GRID_STEPS
    pipelined steps (4 per TC on v7x) and to keep the double-buffered in+out
    blocks under the v7x-safe VMEM budget."""
    stream_per_row = M * (in_bytes + out_bytes)
    tb = max(_SUBLANE, _TARGET_TILE_BYTES // stream_per_row)
    tb = min(tb, max(_SUBLANE, B // _MIN_GRID_STEPS))
    tb = min(tb, _VMEM_BLOCK_BUDGET // (2 * stream_per_row), _MAX_BATCH_TILE)
    tb = max(_SUBLANE, (tb // _SUBLANE) * _SUBLANE)
    if tb >= B:
        return B   # whole batch resident in one block (full-dim block is legal)
    return tb


def sae_forward(x, params, *, compute_dtype=jnp.bfloat16, out_dtype=jnp.bfloat16):
    """Full SAE forward pass as one pipelined Pallas kernel.

    x: (B, nb_movies) float32 — read unpadded, cast to `compute_dtype` in-kernel.
    params: dict from `prepare_params` — w1/w4 already in compute_dtype, the
            rest float32; w* stored as (in, out), b* as (1, out).
    Returns (B, nb_movies) in `out_dtype` (bf16 by default: f32 accumulation
    inside the kernel, cast only on the store).
    """
    B, M = x.shape
    in_bytes = x.dtype.itemsize
    out_bytes = jnp.dtype(out_dtype).itemsize

    TB = _choose_batch_tile(B, M, in_bytes, out_bytes)
    num_tiles = pl.cdiv(B, TB)

    w1, b1 = params["w1"], params["b1"]
    w2, b2 = params["w2"], params["b2"]
    w3, b3 = params["w3"], params["b3"]
    w4, b4 = params["w4"], params["b4"]

    def nbytes(a):
        return int(a.size) * jnp.dtype(a.dtype).itemsize

    weight_bytes = sum(nbytes(a) for a in (w1, b1, w2, b2, w3, b3, w4, b4))

    # Scoped VMEM derived from the actual buffers: double-buffered x/out
    # blocks + (default double-buffered) resident weights + headroom for
    # Mosaic internal scratch. Clamp to [32 MiB default, 64 MiB v7x physical].
    block_bytes = 2 * TB * M * (in_bytes + out_bytes)
    vmem_limit = block_bytes + 2 * weight_bytes + (8 << 20)
    vmem_limit = max(vmem_limit, 32 << 20)
    vmem_limit = min(vmem_limit, 64 << 20)

    def const_spec(arr):
        # Whole array, same block every grid step -> stays resident in VMEM.
        return pl.BlockSpec(arr.shape, lambda b, _n=arr.ndim: (0,) * _n)

    flops = 2 * B * (M * H1 + H1 * H2 + H2 * H1 + H1 * M)
    bytes_accessed = B * M * (in_bytes + out_bytes) + weight_bytes

    kernel = functools.partial(sae_kernel, compute_dtype=compute_dtype)

    return pl.pallas_call(
        kernel,
        out_shape=jax.ShapeDtypeStruct((B, M), out_dtype),
        grid=(num_tiles,),
        in_specs=[
            pl.BlockSpec((TB, M), lambda b: (b, 0)),   # x: tiled over batch only
            const_spec(w1), const_spec(b1),
            const_spec(w2), const_spec(b2),
            const_spec(w3), const_spec(b3),
            const_spec(w4), const_spec(b4),
        ],
        out_specs=pl.BlockSpec((TB, M), lambda b: (b, 0)),
        compiler_params=pltpu.CompilerParams(
            # Batch tiles are independent -> v7x shards the grid across its
            # 2 TensorCores; the tile rule keeps >= 4 steps per core.
            dimension_semantics=("parallel",),
            vmem_limit_bytes=int(vmem_limit),
        ),
        cost_estimate=pl.CostEstimate(
            flops=flops,
            transcendentals=B * (H1 + H2 + H1),
            bytes_accessed=int(bytes_accessed),
        ),
    )(x, w1, b1, w2, b2, w3, b3, w4, b4)


def init_params(key, nb_movies):
    """Deterministic PyTorch-style (uniform +-1/sqrt(fan_in)) init."""
    dims = [(nb_movies, H1), (H1, H2), (H2, H1), (H1, nb_movies)]
    params = {}
    for idx, (fan_in, fan_out) in enumerate(dims, start=1):
        key, kw, kb = jax.random.split(key, 3)
        bound = 1.0 / jnp.sqrt(float(fan_in))
        params[f"w{idx}"] = jax.random.uniform(
            kw, (fan_in, fan_out), jnp.float32, -bound, bound)
        params[f"b{idx}"] = jax.random.uniform(
            kb, (1, fan_out), jnp.float32, -bound, bound)
    return params


def sae_reference(x, params, compute_dtype=jnp.float32):
    """Pure-JAX reference; compute_dtype mirrors the kernel's fc1/fc4 casts."""
    cd = compute_dtype
    h = jax.nn.sigmoid(jnp.dot(x.astype(cd), params["w1"].astype(cd),
                               preferred_element_type=jnp.float32) + params["b1"])
    h = jax.nn.sigmoid(jnp.dot(h, params["w2"],
                               preferred_element_type=jnp.float32) + params["b2"])
    h = jax.nn.sigmoid(jnp.dot(h, params["w3"],
                               preferred_element_type=jnp.float32) + params["b3"])
    return jnp.dot(h.astype(cd), params["w4"].astype(cd),
                   preferred_element_type=jnp.float32) + params["b4"]


if __name__ == "__main__":
    # Synthetic stand-in for int(max(...)) over the ratings data. batch=512
    # with the tile rule above gives an 8-step pipelined grid (TB=64).
    nb_movies = 200
    batch = 512

    key = jax.random.PRNGKey(0)
    key, kx = jax.random.split(key)
    x = jax.random.uniform(kx, (batch, nb_movies), jnp.float32, 0.0, 5.0)

    params = init_params(key, nb_movies)
    prepared = prepare_params(params)      # one-time weight cast, hoisted out of the call

    out = jax.block_until_ready(sae_forward(x, prepared))
    assert out.shape == (batch, nb_movies)
    assert out.dtype == jnp.bfloat16

    # Compare against a reference using the same bf16 casts on fc1/fc4
    # (residual diff: approx-reciprocal sigmoid, bf16 output rounding,
    # accumulation order).
    ref = jax.block_until_ready(sae_reference(x, params, jnp.bfloat16))
    out_f32 = out.astype(jnp.float32)
    max_err = float(jnp.max(jnp.abs(out_f32 - ref)))
    assert jnp.allclose(out_f32, ref, atol=3e-2, rtol=3e-2), \
        f"mismatch vs reference (max abs err {max_err})"

    print("KERNEL_OK")
</pallas_src>

<mosaic_0001>
module attributes {stable_mosaic.version = 11 : i64} {
  func.func @sae_kernel(%arg0: i32, %arg1: memref<64x200xf32, #tpu.memory_space<vmem>>, %arg2: memref<200x20xbf16, #tpu.memory_space<vmem>>, %arg3: memref<1x20xf32, #tpu.memory_space<vmem>>, %arg4: memref<20x10xf32, #tpu.memory_space<vmem>>, %arg5: memref<1x10xf32, #tpu.memory_space<vmem>>, %arg6: memref<10x20xf32, #tpu.memory_space<vmem>>, %arg7: memref<1x20xf32, #tpu.memory_space<vmem>>, %arg8: memref<20x200xbf16, #tpu.memory_space<vmem>>, %arg9: memref<1x200xf32, #tpu.memory_space<vmem>>, %arg10: memref<64x200xbf16, #tpu.memory_space<vmem>>) attributes {dimension_semantics = [#tpu.dimension_semantics<parallel>], iteration_bounds = array<i64: 8>, scalar_prefetch = 0 : i64, scratch_operands = 0 : i64, tpu.core_type = #tpu.core_type<tc>, window_params = [{transform_indices = @transform_0, window_bounds = array<i64: 64, 200>}, {pipeline_mode = #tpu.pipeline_mode<synchronous>, transform_indices = @transform_1, window_bounds = array<i64: 200, 20>}, {pipeline_mode = #tpu.pipeline_mode<synchronous>, transform_indices = @transform_2, window_bounds = array<i64: 1, 20>}, {pipeline_mode = #tpu.pipeline_mode<synchronous>, transform_indices = @transform_3, window_bounds = array<i64: 20, 10>}, {pipeline_mode = #tpu.pipeline_mode<synchronous>, transform_indices = @transform_4, window_bounds = array<i64: 1, 10>}, {pipeline_mode = #tpu.pipeline_mode<synchronous>, transform_indices = @transform_5, window_bounds = array<i64: 10, 20>}, {pipeline_mode = #tpu.pipeline_mode<synchronous>, transform_indices = @transform_6, window_bounds = array<i64: 1, 20>}, {pipeline_mode = #tpu.pipeline_mode<synchronous>, transform_indices = @transform_7, window_bounds = array<i64: 20, 200>}, {pipeline_mode = #tpu.pipeline_mode<synchronous>, transform_indices = @transform_8, window_bounds = array<i64: 1, 200>}, {transform_indices = @transform_9, window_bounds = array<i64: 64, 200>}]} {
    %c0 = arith.constant 0 : index
    %c0_0 = arith.constant 0 : index
    %0 = vector.load %arg1[%c0, %c0_0] : memref<64x200xf32, #tpu.memory_space<vmem>>, vector<64x200xf32>
    %1 = arith.truncf %0 : vector<64x200xf32> to vector<64x200xbf16>
    %c0_1 = arith.constant 0 : index
    %c0_2 = arith.constant 0 : index
    %2 = vector.load %arg2[%c0_1, %c0_2] : memref<200x20xbf16, #tpu.memory_space<vmem>>, vector<200x20xbf16>
    %cst = arith.constant dense<0.000000e+00> : vector<64x20xf32>
    %3 = tpu.matmul %1, %2, %cst {dimension_numbers = #tpu.dot_dimension_numbers<[1], [0], [0], [1], [0, 0, 1, 1], [], []>} : vector<64x200xbf16>, vector<200x20xbf16>, vector<64x20xf32> -> vector<64x20xf32>
    %c0_3 = arith.constant 0 : index
    %c0_4 = arith.constant 0 : index
    %4 = vector.load %arg3[%c0_3, %c0_4] : memref<1x20xf32, #tpu.memory_space<vmem>>, vector<1x20xf32>
    %5 = vector.broadcast %4 : vector<1x20xf32> to vector<64x20xf32>
    %6 = arith.addf %3, %5 : vector<64x20xf32>
    %cst_5 = arith.constant 0.000000e+00 : f32
    %7 = vector.broadcast %cst_5 : f32 to vector<64x20xf32>
    %8 = arith.subf %7, %6 : vector<64x20xf32>
    %9 = math.exp %8 : vector<64x20xf32>
    %cst_6 = arith.constant 1.000000e+00 : f32
    %10 = vector.broadcast %cst_6 : f32 to vector<64x20xf32>
    %11 = arith.addf %10, %9 : vector<64x20xf32>
    %12 = tpu.reciprocal %11 {approx = true} : vector<64x20xf32> -> vector<64x20xf32>
    %c0_7 = arith.constant 0 : index
    %c0_8 = arith.constant 0 : index
    %13 = vector.load %arg4[%c0_7, %c0_8] : memref<20x10xf32, #tpu.memory_space<vmem>>, vector<20x10xf32>
    %cst_9 = arith.constant dense<0.000000e+00> : vector<64x10xf32>
    %14 = tpu.matmul %12, %13, %cst_9 {dimension_numbers = #tpu.dot_dimension_numbers<[1], [0], [0], [1], [0, 0, 1, 1], [], []>} : vector<64x20xf32>, vector<20x10xf32>, vector<64x10xf32> -> vector<64x10xf32>
    %c0_10 = arith.constant 0 : index
    %c0_11 = arith.constant 0 : index
    %15 = vector.load %arg5[%c0_10, %c0_11] : memref<1x10xf32, #tpu.memory_space<vmem>>, vector<1x10xf32>
    %16 = vector.broadcast %15 : vector<1x10xf32> to vector<64x10xf32>
    %17 = arith.addf %14, %16 : vector<64x10xf32>
    %cst_12 = arith.constant 0.000000e+00 : f32
    %18 = vector.broadcast %cst_12 : f32 to vector<64x10xf32>
    %19 = arith.subf %18, %17 : vector<64x10xf32>
    %20 = math.exp %19 : vector<64x10xf32>
    %cst_13 = arith.constant 1.000000e+00 : f32
    %21 = vector.broadcast %cst_13 : f32 to vector<64x10xf32>
    %22 = arith.addf %21, %20 : vector<64x10xf32>
    %23 = tpu.reciprocal %22 {approx = true} : vector<64x10xf32> -> vector<64x10xf32>
    %c0_14 = arith.constant 0 : index
    %c0_15 = arith.constant 0 : index
    %24 = vector.load %arg6[%c0_14, %c0_15] : memref<10x20xf32, #tpu.memory_space<vmem>>, vector<10x20xf32>
    %cst_16 = arith.constant dense<0.000000e+00> : vector<64x20xf32>
    %25 = tpu.matmul %23, %24, %cst_16 {dimension_numbers = #tpu.dot_dimension_numbers<[1], [0], [0], [1], [0, 0, 1, 1], [], []>} : vector<64x10xf32>, vector<10x20xf32>, vector<64x20xf32> -> vector<64x20xf32>
    %c0_17 = arith.constant 0 : index
    %c0_18 = arith.constant 0 : index
    %26 = vector.load %arg7[%c0_17, %c0_18] : memref<1x20xf32, #tpu.memory_space<vmem>>, vector<1x20xf32>
    %27 = vector.broadcast %26 : vector<1x20xf32> to vector<64x20xf32>
    %28 = arith.addf %25, %27 : vector<64x20xf32>
    %cst_19 = arith.constant 0.000000e+00 : f32
    %29 = vector.broadcast %cst_19 : f32 to vector<64x20xf32>
    %30 = arith.subf %29, %28 : vector<64x20xf32>
    %31 = math.exp %30 : vector<64x20xf32>
    %cst_20 = arith.constant 1.000000e+00 : f32
    %32 = vector.broadcast %cst_20 : f32 to vector<64x20xf32>
    %33 = arith.addf %32, %31 : vector<64x20xf32>
    %34 = tpu.reciprocal %33 {approx = true} : vector<64x20xf32> -> vector<64x20xf32>
    %35 = arith.truncf %34 : vector<64x20xf32> to vector<64x20xbf16>
    %c0_21 = arith.constant 0 : index
    %c0_22 = arith.constant 0 : index
    %36 = vector.load %arg8[%c0_21, %c0_22] : memref<20x200xbf16, #tpu.memory_space<vmem>>, vector<20x200xbf16>
    %cst_23 = arith.constant dense<0.000000e+00> : vector<64x200xf32>
    %37 = tpu.matmul %35, %36, %cst_23 {dimension_numbers = #tpu.dot_dimension_numbers<[1], [0], [0], [1], [0, 0, 1, 1], [], []>} : vector<64x20xbf16>, vector<20x200xbf16>, vector<64x200xf32> -> vector<64x200xf32>
    %c0_24 = arith.constant 0 : index
    %c0_25 = arith.constant 0 : index
    %38 = vector.load %arg9[%c0_24, %c0_25] : memref<1x200xf32, #tpu.memory_space<vmem>>, vector<1x200xf32>
    %39 = vector.broadcast %38 : vector<1x200xf32> to vector<64x200xf32>
    %40 = arith.addf %37, %39 : vector<64x200xf32>
    %41 = arith.truncf %40 : vector<64x200xf32> to vector<64x200xbf16>
    %c0_26 = arith.constant 0 : index
    %c0_27 = arith.constant 0 : index
    %42 = vector.load %arg10[%c0_26, %c0_27] : memref<64x200xbf16, #tpu.memory_space<vmem>>, vector<64x200xbf16>
    tpu.vector_store %arg10[%c0_26, %c0_27], %41 {strides = array<i32>} : memref<64x200xbf16, #tpu.memory_space<vmem>>, vector<64x200xbf16>,
    return
  }
  func.func @transform_0(%arg0: i32) -> (i32, i32) {
    %c0_i32 = arith.constant 0 : i32
    %c0_i32_0 = arith.constant 0 : i32
    return %arg0, %c0_i32 : i32, i32
  }
  func.func @transform_1(%arg0: i32) -> (i32, i32) {
    %c0_i32 = arith.constant 0 : i32
    %c0_i32_0 = arith.constant 0 : i32
    %c0_i32_1 = arith.constant 0 : i32
    return %c0_i32, %c0_i32_0 : i32, i32
  }
  func.func @transform_2(%arg0: i32) -> (i32, i32) {
    %c0_i32 = arith.constant 0 : i32
    %c0_i32_0 = arith.constant 0 : i32
    %c0_i32_1 = arith.constant 0 : i32
    return %c0_i32, %c0_i32_0 : i32, i32
  }
  func.func @transform_3(%arg0: i32) -> (i32, i32) {
    %c0_i32 = arith.constant 0 : i32
    %c0_i32_0 = arith.constant 0 : i32
    %c0_i32_1 = arith.constant 0 : i32
    return %c0_i32, %c0_i32_0 : i32, i32
  }
  func.func @transform_4(%arg0: i32) -> (i32, i32) {
    %c0_i32 = arith.constant 0 : i32
    %c0_i32_0 = arith.constant 0 : i32
    %c0_i32_1 = arith.constant 0 : i32
    return %c0_i32, %c0_i32_0 : i32, i32
  }
  func.func @transform_5(%arg0: i32) -> (i32, i32) {
    %c0_i32 = arith.constant 0 : i32
    %c0_i32_0 = arith.constant 0 : i32
    %c0_i32_1 = arith.constant 0 : i32
    return %c0_i32, %c0_i32_0 : i32, i32
  }
  func.func @transform_6(%arg0: i32) -> (i32, i32) {
    %c0_i32 = arith.constant 0 : i32
    %c0_i32_0 = arith.constant 0 : i32
    %c0_i32_1 = arith.constant 0 : i32
    return %c0_i32, %c0_i32_0 : i32, i32
  }
  func.func @transform_7(%arg0: i32) -> (i32, i32) {
    %c0_i32 = arith.constant 0 : i32
    %c0_i32_0 = arith.constant 0 : i32
    %c0_i32_1 = arith.constant 0 : i32
    return %c0_i32, %c0_i32_0 : i32, i32
  }
  func.func @transform_8(%arg0: i32) -> (i32, i32) {
    %c0_i32 = arith.constant 0 : i32
    %c0_i32_0 = arith.constant 0 : i32
    %c0_i32_1 = arith.constant 0 : i32
    return %c0_i32, %c0_i32_0 : i32, i32
  }
  func.func @transform_9(%arg0: i32) -> (i32, i32) {
    %c0_i32 = arith.constant 0 : i32
    %c0_i32_0 = arith.constant 0 : i32
    return %arg0, %c0_i32 : i32, i32
  }
}

</mosaic_0001>

<bundles_post_ra>
// kernel: tpu_custom_call.1
= control target key start
LH: loop header
LB: loop body
LE: loop exit
PB: predicated region body
PF: predicated region fallthrough
CT: control target
= control target key end

     0   :  { %s1529_s30 = smov 0   ;;  %s1721_s0 = inlined_call_operand.vmem [shape: f32[512,200], index: 0, kind: input, shape index: {}]   ;;  %s1722_s1 = inlined_call_operand.vmem [shape: bf16[200,20], index: 1, kind: input, shape index: {}]   ;;  %s1723_s2 = inlined_call_operand.vmem [shape: f32[1,20], index: 2, kind: input, shape index: {}]   ;;  %s1724_s3 = inlined_call_operand.vmem [shape: f32[20,10], index: 3, kind: input, shape index: {}]   ;;  %s1725_s4 = inlined_call_operand.vmem [shape: f32[1,10], index: 4, kind: input, shape index: {}]   ;;  %s1726_s5 = inlined_call_operand.vmem [shape: f32[10,20], index: 5, kind: input, shape index: {}]   ;;  %s1727_s6 = inlined_call_operand.vmem [shape: f32[1,20], index: 6, kind: input, shape index: {}]   ;;  %s1728_s7 = inlined_call_operand.vmem [shape: bf16[20,200], index: 7, kind: input, shape index: {}]   ;;  %s1729_s8 = inlined_call_operand.vmem [shape: f32[1,200], index: 8, kind: input, shape index: {}]   ;;  %s1730_s9 = inlined_call_operand.vmem [shape: bf16[512,200], index: 9, kind: output, shape index: {}]  }
   0x1 LB: > { %s1202_s10 = sadd.s32 4294967295, %s1475_s30   ;;  %p1206_p0 = scmp.ge.s32.totalorder %s1475_s30, 1  ;;  %s1475_s30 = sphi %s1529_s30, %s19_s30  }
   0x2   : > { %p289_p1 = scmp.lt.s32.totalorder %s1475_s30, 9 }
   0x4   : > { %p290_p2 = pnand %p1206_p0, %p289_p1 }
   0x5   : > { %v1355_v0 = vld [vmem:[%s1722_s1] sm:$0xff] (!%p290_p2)   ;;  %v1477_v1 = vmov (!%p290_p2), 0   ;;  %v1356_v2 = vld [vmem:[%s1722_s1 + $0x8] sm:$0xff] (!%p290_p2)   ;;  %s1207_s15 = sshll.u32 (!%p290_p2), %s1202_s10, 3  ;;  %v1357_v3 = vld [vmem:[%s1722_s1 + $0x10] sm:$0xff] (!%p290_p2)   ;;  %vm473_vm0 = vcmask (!%p290_p2), 588800  }
   0x6   : > { %293 = sbr.rel (%p290_p2) target bundleno = 1035 (0x40b), region = 56  ;;  %490 = vmatprep.subr.bf16.mxu0 (!%p290_p2), %v1477_v1  ;;  %p328_p3 = scmp.lt.s32.totalorder (!%p290_p2), %s1207_s15, 63  ;;  %v1358_v4 = vld [vmem:[%s1722_s1 + $0x18] sm:$0xff] (!%p290_p2)   ;;  %v1359_v7 = vld [vmem:[%s1722_s1 + $0x20] sm:$0xff] (!%p290_p2)   ;;  %v1360_v9 = vld [vmem:[%s1722_s1 + $0x28] sm:$0xff] (!%p290_p2)   ;;  %vm486_vm1 = vcmask (!%p290_p2), 1043456  }
   0x7   : > { %491 = vmatpush1.bf16.msra.mxu0 (!%p290_p2), %v1355_v0  ;;  %v1361_v10 = vld [vmem:[%s1722_s1 + $0x30] sm:$0xff] (!%p290_p2)   ;;  %v1362_v11 = vld [vmem:[%s1722_s1 + $0x38] sm:$0xff] (!%p290_p2)   ;;  %v1363_v12 = vld [vmem:[%s1722_s1 + $0x40] sm:$0xff] (!%p290_p2)   ;;  %vm605_vm2 = vcmask (!%p290_p2), 162816   ;;  %vm812_vm3 = vcmask (!%p290_p2), 1041408   ;;  %vm1478_vm4 = vmmov (!%p290_p2), 1  }
   0x8   : > { %492 = vmatprep.subr.bf16.mxu0 (!%p290_p2), %v1477_v1  ;;  %v1364_v13 = vld [vmem:[%s1722_s1 + $0x48] sm:$0xff] (!%p290_p2)   ;;  %v1365_v14 = vld [vmem:[%s1722_s1 + $0x50] sm:$0xff] (!%p290_p2)   ;;  %v1366_v15 = vld [vmem:[%s1722_s1 + $0x58] sm:$0xff] (!%p290_p2)   ;;  %vm787_vm6 = vcmask (!%p290_p2), 80896   ;;  %vm1134_vm7 = vcmask (!%p290_p2), 588804  }
   0x9   : > { %v1367_v16 = vld [vmem:[%s1722_s1 + $0x60] ss:$0 sps:$4 sm:$0xff] (!%p290_p2)   ;;  %v596_v40 = vld [vmem:[%s1724_s3 + $0x8] sm:$0xff] (!%p290_p2)  ;;  %v597_v42 = vld [vmem:[%s1724_s3 + $0x10] sm:$0xf] (!%p290_p2) }
   0xa   : > { %v488_v19 = vsel (!%p290_p2), %vm486_vm1, %v1367_v16, 0  ;;  %v595_v39 = vld [vmem:[%s1724_s3] sm:$0xff] (!%p290_p2)  ;;  %vm1340_vm5 = vmpackc.low (!%p290_p2), %vm812_vm3, %vm1478_vm4 }
   0xb   : > { %493 = vmatpush1.bf16.msra.mxu0 (!%p290_p2), %v1356_v2  ;;  %v1335_v41 = vpack.c.bf16 (!%p290_p2), %v596_v40, %v595_v39  ;;  %v1213_v43 = vld [vmem:[%s1723_s2] ss:$0 sm:$0xff] (!%p290_p2)  ;;  %vm1685_vm8 = vmor (!%p290_p2), %vm1134_vm7, %vm486_vm1 }
   0xc   : > { %494 = vmatprep.subr.bf16.mxu0 (!%p290_p2), %v1477_v1 }
   0xd   : > { %s1734_s15 = smov (!%p328_p3, %s1207_s15), 63  ;;  %1336 = vmatprep.subr.bf16.mxu1 %v1335_v41 }
   0xe   : > { %s1270_s18 = sshll.u32 %s1734_s15, 4  ;;  %1338 = vmatpush3.bf16.msra.mxu1 %v1335_v41  ;;  %s1271_s29 = sshll.u32 %s1734_s15, 3 }
   0xf   : > { %495 = vmatpush1.bf16.msra.mxu0 %v1357_v3  ;;  %s1558_s23 = scalar_lea.vmem %s1721_s0, %s1270_s18  ;;  %1305 = vmatprep.subr.msk.mxu1 %vm486_vm1, %v597_v42  ;;  %s1692_s11 = scalar_lea.vmem %s1730_s9, %s1271_s29 }
  0x10   : > { %496 = vmatprep.subr.bf16.mxu0 %v1477_v1  ;;  %v343_v5 = vld [vmem:[%s1558_s23 + $0x8] sm:$0xff]  ;;  %v345_v6 = vld [vmem:[%s1558_s23 + $0x18] sm:$0xff]  ;;  %v342_v17 = vld [vmem:[%s1558_s23] sm:$0xff] }
  0x11   : > { %v359_v8 = vpack.c.bf16 %v345_v6, %v343_v5  ;;  %v344_v18 = vld [vmem:[%s1558_s23 + $0x10] sm:$0xff]  ;;  %v347_v20 = vld [vmem:[%s1558_s23 + $0x28] sm:$0xff]  ;;  %v349_v21 = vld [vmem:[%s1558_s23 + $0x38] sm:$0xff] }
  0x12   : > { %v358_v22 = vpack.c.bf16 %v344_v18, %v342_v17  ;;  %v361_v23 = vpack.c.bf16 %v349_v21, %v347_v20  ;;  %v346_v24 = vld [vmem:[%s1558_s23 + $0x20] sm:$0xff]  ;;  %v348_v25 = vld [vmem:[%s1558_s23 + $0x30] sm:$0xff]  ;;  %v351_v26 = vld [vmem:[%s1558_s23 + $0x48] sm:$0xff]  ;;  %1306 = vmatpush3.msk.msra.mxu1 %vm486_vm1, %v597_v42 }
  0x13   : > { %497 = vmatpush1.bf16.msra.mxu0 %v1358_v4  ;;  %1227 = vmatprep.mubr.msk.bf16.mxu0 %vm473_vm0, %v359_v8  ;;  %v353_v27 = vld [vmem:[%s1558_s23 + $0x58] sm:$0xff]  ;;  %v360_v28 = vpack.c.bf16 %v348_v25, %v346_v24  ;;  %v350_v30 = vld [vmem:[%s1558_s23 + $0x40] sm:$0xff]  ;;  %v352_v31 = vld [vmem:[%s1558_s23 + $0x50] sm:$0xff] }
  0x14   : > { %498 = vmatprep.subr.bf16.mxu0 %v1477_v1  ;;  %v363_v29 = vpack.c.bf16 %v353_v27, %v351_v26  ;;  %v355_v32 = vld [vmem:[%s1558_s23 + $0x68] sm:$0xff]  ;;  %v357_v33 = vld [vmem:[%s1558_s23 + $0x78] sm:$0xff]  ;;  %v362_v34 = vpack.c.bf16 %v352_v31, %v350_v30  ;;  %v354_v36 = vld [vmem:[%s1558_s23 + $0x60] sm:$0xff] }
  0x15   : > { %v365_v35 = vpack.c.bf16 %v357_v33, %v355_v32  ;;  %v356_v37 = vld [vmem:[%s1558_s23 + $0x70] sm:$0xff] }
  0x16   : > { %v364_v38 = vpack.c.bf16 %v356_v37, %v354_v36 }
  0x17   : > { %499 = vmatpush1.bf16.msra.mxu0 %v1359_v7 }
  0x18   : > { %500 = vmatprep.subr.bf16.mxu0 %v1477_v1 }
  0x1b   : > { %501 = vmatpush1.bf16.msra.mxu0 %v1360_v9 }
  0x1c   : > { %502 = vmatprep.subr.bf16.mxu0 %v1477_v1 }
  0x1f   : > { %503 = vmatpush1.bf16.msra.mxu0 %v1361_v10 }
  0x20   : > { %504 = vmatprep.subr.bf16.mxu0 %v1477_v1 }
  0x23   : > { %505 = vmatpush1.bf16.msra.mxu0 %v1362_v11 }
  0x24   : > { %506 = vmatprep.subr.bf16.mxu0 %v1477_v1 }
  0x27   : > { %507 = vmatpush1.bf16.msra.mxu0 %v1363_v12 }
  0x28   : > { %508 = vmatprep.subr.bf16.mxu0 %v1477_v1 }
  0x2b   : > { %509 = vmatpush1.bf16.msra.mxu0 %v1364_v13 }
  0x2c   : > { %510 = vmatprep.subr.bf16.mxu0 %v1477_v1 }
  0x2f   : > { %511 = vmatpush1.bf16.msra.mxu0 %v1365_v14 }
  0x30   : > { %512 = vmatprep.subr.bf16.mxu0 %v1477_v1 }
  0x33   : > { %513 = vmatpush1.bf16.msra.mxu0 %v1366_v15 }
  0x34   : > { %514 = vmatprep.subr.bf16.mxu0 %v1477_v1 }
  0x37   : > { %515 = vmatpush1.bf16.msra.mxu0 %v488_v19 }
  0x3a   : > { %523 = vmatmul.mubr.bf16.vlgmr.msra.gmra.mrb[0].mxu0 %v358_v22 }
  0x3b   : > { %1228 = vmatprep.mubr.msk.bf16.mxu0 %vm473_vm0, %v361_v23 }
  0x42   : > { %531 = vmatmul.mubr.bf16.gmra.mrb[4].mxu0 %v360_v28 }
  0x43   : > { %1229 = vmatprep.mubr.msk.bf16.mxu0 %vm473_vm0, %v363_v29 }
  0x4a   : > { %539 = vmatmul.mubr.bf16.gmra.mrb[8].mxu0 %v362_v34 }
  0x4b   : > { %1230 = vmatprep.mubr.msk.bf16.mxu0 %vm473_vm0, %v365_v35 }
  0x52   : > { %547 = vmatmul.mubr.bf16.gmra.mrb[12].mxu0 %v364_v38 }
 0x10d   : > { %v524_v44 = vpop.f32.mrb[0].mxu0 }
 0x10e   : > { %v525_v45 = vadd.f32 %v1213_v43, %v524_v44  ;;  %v526_v46 = vpop.f32.mrb[1].mxu0 }
 0x10f   : > { %v527_v47 = vpop.f32.mrb[2].mxu0  ;;  %v779_v46 = vld [vmem:[%s1726_s5 + $0x8] sm:$0x3] }
 0x110   : > { %v555_v48 = vsub.f32 0.0, %v525_v45  ;;  %v528_v49 = vadd.f32 %v1213_v43, %v527_v47  ;;  %v529_v50 = vpop.f32.mrb[3].mxu0  ;;  %v778_v45 = vld [vmem:[%s1726_s5] sm:$0xff] }
 0x111   : > { %v1339_v47 = vpack.c.bf16 %v779_v46, %v778_v45 }
 0x112   : > { %v563_v51 = vmul.f32 1.442695, %v555_v48  ;;  %v556_v52 = vsub.f32 0.0, %v528_v49  ;;  %v1231_v48 = vld [vmem:[%s1725_s4] ss:$0 sm:$0xff] }
 0x113   : > { %1341 = vmatprep.subr.msk.bf16.mxu1 %vm1340_vm5, %v1339_v47 }
 0x114   : > { %1373 = vpow2.f32 %v563_v51  ;;  %v565_v53 = vmul.f32 1.442695, %v556_v52 }
 0x115   : > { %v532_v54 = vpop.f32.mrb[4].mxu0 }
 0x116   : > { %1375 = vpow2.f32 %v565_v53  ;;  %v533_v55 = vadd.f32 %v1213_v43, %v532_v54  ;;  %v534_v56 = vpop.f32.mrb[5].mxu0 }
 0x117   : > { %v535_v57 = vpop.f32.mrb[6].mxu0 }
 0x118   : > { %v557_v58 = vsub.f32 0.0, %v533_v55  ;;  %v536_v59 = vadd.f32 %v1213_v43, %v535_v57  ;;  %v537_v60 = vpop.f32.mrb[7].mxu0 }
 0x11a   : > { %v567_v61 = vmul.f32 1.442695, %v557_v58  ;;  %v558_v62 = vsub.f32 0.0, %v536_v59 }
 0x11c   : > { %1377 = vpow2.f32 %v567_v61  ;;  %v569_v63 = vmul.f32 1.442695, %v558_v62 }
 0x11d   : > { %v540_v0 = vpop.f32.mrb[8].mxu0 }
 0x11e   : > { %v1374_v2 = vpop.eup %1373  ;;  %1379 = vpow2.f32 %v569_v63  ;;  %v541_v3 = vadd.f32 %v1213_v43, %v540_v0  ;;  %v542_v4 = vpop.f32.mrb[9].mxu0 }
 0x11f   : > { %v579_v5 = vadd.f32 1.0, %v1374_v2  ;;  %v543_v6 = vpop.f32.mrb[10].mxu0 }
 0x120   : > { %v1376_v7 = vpop.eup %1375  ;;  %v559_v8 = vsub.f32 0.0, %v541_v3  ;;  %v544_v9 = vadd.f32 %v1213_v43, %v543_v6  ;;  %v545_v10 = vpop.f32.mrb[11].mxu0 }
 0x121   : > { %1381 = vrcp.f32 %v579_v5  ;;  %v580_v11 = vadd.f32 1.0, %v1376_v7 }
 0x122   : > { %v571_v12 = vmul.f32 1.442695, %v559_v8  ;;  %v560_v13 = vsub.f32 0.0, %v544_v9 }
 0x123   : > { %1383 = vrcp.f32 %v580_v11 }
 0x124   : > { %1385 = vpow2.f32 %v571_v12  ;;  %v573_v14 = vmul.f32 1.442695, %v560_v13 }
 0x125   : > { %v548_v15 = vpop.f32.mrb[12].mxu0 }
 0x126   : > { %v1378_v16 = vpop.eup %1377  ;;  %1387 = vpow2.f32 %v573_v14  ;;  %v549_v17 = vadd.f32 %v1213_v43, %v548_v15  ;;  %v550_v18 = vpop.f32.mrb[13].mxu0 }
 0x127   : > { %v581_v19 = vadd.f32 1.0, %v1378_v16  ;;  %v551_v20 = vpop.f32.mrb[14].mxu0 }
 0x128   : > { %v1380_v21 = vpop.eup %1379  ;;  %v561_v22 = vsub.f32 0.0, %v549_v17  ;;  %v552_v23 = vadd.f32 %v1213_v43, %v551_v20  ;;  %v553_v24 = vpop.f32.mrb[15].mxu0 }
 0x129   : > { %1389 = vrcp.f32 %v581_v19  ;;  %v582_v25 = vadd.f32 1.0, %v1380_v21 }
 0x12a   : > { %v575_v26 = vmul.f32 1.442695, %v561_v22  ;;  %v562_v27 = vsub.f32 0.0, %v552_v23 }
 0x12b   : > { %v1382_v28 = vpop.eup %1381  ;;  %1391 = vrcp.f32 %v582_v25 }
 0x12c   : > { %1393 = vpow2.f32 %v575_v26  ;;  %v577_v29 = vmul.f32 1.442695, %v562_v27  ;;  %1307 = vmatprep.mubr.msk.f32.mxu1 %vm605_vm2, %v1382_v28 }
 0x12d   : > { %v1384_v30 = vpop.eup %1383 }
 0x12e   : > { %v1386_v31 = vpop.eup %1385  ;;  %1395 = vpow2.f32 %v577_v29  ;;  %1308 = vmatmul.mubr.msk.f32.vlgmr.msra.gmra.mrb[0].mxu1 %vm605_vm2, %v1384_v30 }
 0x12f   : > { %v583_v32 = vadd.f32 1.0, %v1386_v31  ;;  %1344 = vmatpush3.bf16.msk.msra.mxu1 %vm1340_vm5, %v1339_v47 }
 0x130   : > { %v1388_v33 = vpop.eup %1387 }
 0x131   : > { %1397 = vrcp.f32 %v583_v32  ;;  %v584_v34 = vadd.f32 1.0, %v1388_v33 }
 0x133   : > { %v1390_v35 = vpop.eup %1389  ;;  %1399 = vrcp.f32 %v584_v34 }
 0x134   : > { %1310 = vmatprep.mubr.msk.f32.mxu1 %vm605_vm2, %v1390_v35 }
 0x135   : > { %v1392_v36 = vpop.eup %1391 }
 0x136   : > { %v1394_v37 = vpop.eup %1393  ;;  %1311 = vmatmul.mubr.msk.f32.gmra.mrb[2].mxu1 %vm605_vm2, %v1392_v36 }
 0x137   : > { %v585_v38 = vadd.f32 1.0, %v1394_v37 }
 0x138   : > { %v1396_v39 = vpop.eup %1395 }
 0x139   : > { %1401 = vrcp.f32 %v585_v38  ;;  %v586_v40 = vadd.f32 1.0, %v1396_v39 }
 0x13b   : > { %v1398_v41 = vpop.eup %1397  ;;  %1403 = vrcp.f32 %v586_v40 }
 0x13c   : > { %1313 = vmatprep.mubr.msk.f32.mxu1 %vm605_vm2, %v1398_v41 }
 0x13d   : > { %v1400_v42 = vpop.eup %1399 }
 0x13e   : > { %1314 = vmatmul.mubr.msk.f32.gmra.mrb[4].mxu1 %vm605_vm2, %v1400_v42  ;;  %v1370_v42 = vld [vmem:[%s1728_s7 + $0x4] ss:$8 sps:$4 sm:$0xff]  }
 0x13f   : > { %1013 = vmatprep.subr.bf16.mxu1 %v1370_v42 }
 0x143   : > { %v1402_v43 = vpop.eup %1401 }
 0x144   : > { %1316 = vmatprep.mubr.msk.f32.mxu1 %vm605_vm2, %v1402_v43  ;;  %v1368_v43 = vld [vmem:[%s1728_s7] ss:$8 sps:$4 sm:$0xff]  }
 0x145   : > { %v1404_v44 = vpop.eup %1403 }
 0x146   : > { %1317 = vmatmul.mubr.msk.f32.gmra.mrb[6].mxu1 %vm605_vm2, %v1404_v44  ;;  %v967_v44 = vld [vmem:[%s1728_s7 + $0x10] sm:$0x33] }
 0x147   : > { %v1254_v45 = vcombine.high %v967_v44, %v967_v44  ;;  %v1253_v46 = vcombine.low %v967_v44, %v967_v44 }
 0x149   : > { %v1008_v47 = vsel %vm812_vm3, %v1253_v46, 0  ;;  %v970_v46 = vlaneseq }
 0x201   : > { %v1309_v49 = vpop.f32.mrb[0].mxu1 }
 0x202   : > { %v705_v50 = vadd.f32 %v1309_v49, %v1231_v48  ;;  %v699_v51 = vpop.f32.mrb[1].mxu1 }
 0x203   : > { %v700_v52 = vadd.f32 %v1231_v48, %v699_v51 }
 0x204   : > { %v739_v53 = vsub.f32 0.0, %v705_v50 }
 0x205   : > { %v738_v54 = vsub.f32 0.0, %v700_v52 }
 0x206   : > { %v748_v55 = vmul.f32 1.442695, %v739_v53 }
 0x207   : > { %v746_v56 = vmul.f32 1.442695, %v738_v54 }
 0x208   : > { %1405 = vpow2.f32 %v748_v55 }
 0x209   : > { %1407 = vpow2.f32 %v746_v56  ;;  %v1312_v57 = vpop.f32.mrb[2].mxu1 }
 0x20a   : > { %v715_v58 = vadd.f32 %v1312_v57, %v1231_v48  ;;  %v709_v59 = vpop.f32.mrb[3].mxu1 }
 0x20b   : > { %v710_v60 = vadd.f32 %v1231_v48, %v709_v59 }
 0x20c   : > { %v741_v61 = vsub.f32 0.0, %v715_v58 }
 0x20d   : > { %v740_v62 = vsub.f32 0.0, %v710_v60 }
 0x20e   : > { %v752_v63 = vmul.f32 1.442695, %v741_v61 }
 0x20f   : > { %v750_v0 = vmul.f32 1.442695, %v740_v62 }
 0x210   : > { %1409 = vpow2.f32 %v752_v63 }
 0x211   : > { %1411 = vpow2.f32 %v750_v0  ;;  %v1315_v2 = vpop.f32.mrb[4].mxu1 }
 0x212   : > { %v1406_v3 = vpop.eup %1405  ;;  %v725_v4 = vadd.f32 %v1315_v2, %v1231_v48  ;;  %v719_v5 = vpop.f32.mrb[5].mxu1 }
 0x213   : > { %v1408_v6 = vpop.eup %1407  ;;  %v763_v7 = vadd.f32 1.0, %v1406_v3  ;;  %v720_v8 = vadd.f32 %v1231_v48, %v719_v5 }
 0x214   : > { %v762_v9 = vadd.f32 1.0, %v1408_v6  ;;  %v743_v10 = vsub.f32 0.0, %v725_v4 }
 0x215   : > { %v742_v11 = vsub.f32 0.0, %v720_v8 }
 0x216   : > { %1413 = vrcp.f32 %v762_v9  ;;  %v756_v12 = vmul.f32 1.442695, %v743_v10 }
 0x217   : > { %1415 = vrcp.f32 %v763_v7  ;;  %v754_v13 = vmul.f32 1.442695, %v742_v11 }
 0x218   : > { %1417 = vpow2.f32 %v756_v12 }
 0x219   : > { %1419 = vpow2.f32 %v754_v13  ;;  %v1318_v14 = vpop.f32.mrb[6].mxu1 }
 0x21a   : > { %v1410_v15 = vpop.eup %1409  ;;  %v735_v16 = vadd.f32 %v1318_v14, %v1231_v48  ;;  %v729_v17 = vpop.f32.mrb[7].mxu1 }
 0x21b   : > { %v1412_v18 = vpop.eup %1411  ;;  %v765_v19 = vadd.f32 1.0, %v1410_v15  ;;  %v730_v20 = vadd.f32 %v1231_v48, %v729_v17  ;;  %v1241_v48 = vld [vmem:[%s1727_s6] ss:$0 sm:$0xff] }
 0x21c   : > { %v764_v21 = vadd.f32 1.0, %v1412_v18  ;;  %v745_v22 = vsub.f32 0.0, %v735_v16 }
 0x21d   : > { %v744_v23 = vsub.f32 0.0, %v730_v20 }
 0x21e   : > { %1421 = vrcp.f32 %v764_v21  ;;  %v760_v24 = vmul.f32 1.442695, %v745_v22 }
 0x21f   : > { %1423 = vrcp.f32 %v765_v19  ;;  %v758_v25 = vmul.f32 1.442695, %v744_v23 }
 0x220   : > { %v1414_v26 = vpop.eup %1413  ;;  %1425 = vpow2.f32 %v760_v24 }
 0x221   : > { %v1416_v27 = vpop.eup %1415  ;;  %1427 = vpow2.f32 %v758_v25  ;;  %1323 = vmatprep.mubr.msk.f32.mxu1 %vm787_vm6, %v1414_v26 }
 0x222   : > { %v1418_v28 = vpop.eup %1417  ;;  %1324 = vmatmul.mubr.msk.f32.vlgmr.msra.gmra.mrb[8].mxu1 %vm787_vm6, %v1416_v27 }
 0x223   : > { %v1420_v29 = vpop.eup %1419  ;;  %v767_v30 = vadd.f32 1.0, %v1418_v28  ;;  %1014 = vmatpush1.bf16.msra.mxu1 %v1368_v43 }
 0x224   : > { %v766_v31 = vadd.f32 1.0, %v1420_v29  ;;  %1255 = vmatprep.subr.msk.bf16.mxu1 %vm812_vm3, %v1254_v45 }
 0x226   : > { %1429 = vrcp.f32 %v766_v31 }
 0x227   : > { %1431 = vrcp.f32 %v767_v30  ;;  %1016 = vmatpush1.bf16.msra.mxu1 %v1008_v47  ;;  %v971_v47 = vshrl.u32 %v970_v46, 7 }
 0x228   : > { %v1422_v32 = vpop.eup %1421 }
 0x229   : > { %v1424_v33 = vpop.eup %1423  ;;  %1326 = vmatprep.mubr.msk.f32.mxu1 %vm787_vm6, %v1422_v32 }
 0x22a   : > { %v1426_v34 = vpop.eup %1425  ;;  %1327 = vmatmul.mubr.msk.f32.gmra.mrb[10].mxu1 %vm787_vm6, %v1424_v33 }
 0x22b   : > { %v1428_v35 = vpop.eup %1427  ;;  %v769_v36 = vadd.f32 1.0, %v1426_v34 }
 0x22c   : > { %v768_v37 = vadd.f32 1.0, %v1428_v35 }
 0x22e   : > { %1433 = vrcp.f32 %v768_v37 }
 0x22f   : > { %1435 = vrcp.f32 %v769_v36 }
 0x230   : > { %v1430_v38 = vpop.eup %1429 }
 0x231   : > { %v1432_v39 = vpop.eup %1431  ;;  %1329 = vmatprep.mubr.msk.f32.mxu1 %vm787_vm6, %v1430_v38 }
 0x232   : > { %1330 = vmatmul.mubr.msk.f32.gmra.mrb[12].mxu1 %vm787_vm6, %v1432_v39 }
 0x238   : > { %v1434_v40 = vpop.eup %1433 }
 0x239   : > { %v1436_v41 = vpop.eup %1435  ;;  %1332 = vmatprep.mubr.msk.f32.mxu1 %vm787_vm6, %v1434_v40 }
 0x23a   : > { %1333 = vmatmul.mubr.msk.f32.gmra.mrb[14].mxu1 %vm787_vm6, %v1436_v41 }
 0x23b   : > { %1045 = vmatprep.mubr.bf16.mxu1 %v1477_v1 }
 0x2f5   : > { %v1325_v49 = vpop.f32.mrb[8].mxu1 }
 0x2f6   : > { %v888_v50 = vadd.f32 %v1325_v49, %v1241_v48  ;;  %v882_v51 = vpop.f32.mrb[9].mxu1  ;;  %v968_v49 = vld [vmem:[%s1729_s8] sm:$0x3] }
 0x2f7   : > { %v883_v52 = vadd.f32 %v1241_v48, %v882_v51 }
 0x2f8   : > { %v922_v53 = vsub.f32 0.0, %v888_v50  ;;  %v976_v50 = vsub.s32 1, %v971_v47 }
 0x2f9   : > { %v921_v54 = vsub.f32 0.0, %v883_v52 }
 0x2fa   : > { %v931_v55 = vmul.f32 1.442695, %v922_v53  ;;  %v977_v52 = vrot.slane %v968_v49, %v976_v50 }
 0x2fb   : > { %v929_v56 = vmul.f32 1.442695, %v921_v54 }
 0x2fc   : > { %1437 = vpow2.f32 %v931_v55 }
 0x2fd   : > { %1439 = vpow2.f32 %v929_v56  ;;  %v1328_v57 = vpop.f32.mrb[10].mxu1 }
 0x2fe   : > { %v898_v58 = vadd.f32 %v1328_v57, %v1241_v48  ;;  %v892_v59 = vpop.f32.mrb[11].mxu1 }
 0x2ff   : > { %v893_v60 = vadd.f32 %v1241_v48, %v892_v59 }
 0x300   : > { %v924_v61 = vsub.f32 0.0, %v898_v58 }
 0x301   : > { %v923_v62 = vsub.f32 0.0, %v893_v60 }
 0x302   : > { %v935_v63 = vmul.f32 1.442695, %v924_v61 }
 0x303   : > { %v933_v0 = vmul.f32 1.442695, %v923_v62 }
 0x304   : > { %1441 = vpow2.f32 %v935_v63 }
 0x305   : > { %1443 = vpow2.f32 %v933_v0  ;;  %v1331_v2 = vpop.f32.mrb[12].mxu1 }
 0x306   : > { %v1438_v3 = vpop.eup %1437  ;;  %v908_v4 = vadd.f32 %v1331_v2, %v1241_v48  ;;  %v902_v5 = vpop.f32.mrb[13].mxu1 }
 0x307   : > { %v1440_v6 = vpop.eup %1439  ;;  %v946_v7 = vadd.f32 1.0, %v1438_v3  ;;  %v903_v8 = vadd.f32 %v1241_v48, %v902_v5 }
 0x308   : > { %v945_v9 = vadd.f32 1.0, %v1440_v6  ;;  %v926_v10 = vsub.f32 0.0, %v908_v4 }
 0x309   : > { %1445 = vrcp.f32 %v946_v7  ;;  %v925_v11 = vsub.f32 0.0, %v903_v8 }
 0x30a   : > { %1447 = vrcp.f32 %v945_v9  ;;  %v939_v12 = vmul.f32 1.442695, %v926_v10 }
 0x30b   : > { %v937_v13 = vmul.f32 1.442695, %v925_v11 }
 0x30c   : > { %1449 = vpow2.f32 %v939_v12 }
 0x30d   : > { %1451 = vpow2.f32 %v937_v13  ;;  %v1334_v14 = vpop.f32.mrb[14].mxu1 }
 0x30e   : > { %v1442_v15 = vpop.eup %1441  ;;  %v918_v16 = vadd.f32 %v1334_v14, %v1241_v48  ;;  %v912_v17 = vpop.f32.mrb[15].mxu1 }
 0x30f   : > { %v1444_v18 = vpop.eup %1443  ;;  %v948_v19 = vadd.f32 1.0, %v1442_v15  ;;  %v913_v20 = vadd.f32 %v1241_v48, %v912_v17  ;;  %v972_v48 = vsub.s32 0, %v971_v47 }
 0x310   : > { %v947_v21 = vadd.f32 1.0, %v1444_v18  ;;  %v928_v22 = vsub.f32 0.0, %v918_v16 }
 0x311   : > { %1453 = vrcp.f32 %v948_v19  ;;  %v927_v23 = vsub.f32 0.0, %v913_v20  ;;  %v973_v51 = vrot.slane %v968_v49, %v972_v48 }
 0x312   : > { %1455 = vrcp.f32 %v947_v21  ;;  %v943_v24 = vmul.f32 1.442695, %v928_v22 }
 0x313   : > { %v1446_v25 = vpop.eup %1445  ;;  %v941_v26 = vmul.f32 1.442695, %v927_v23 }
 0x314   : > { %v1448_v27 = vpop.eup %1447  ;;  %1457 = vpow2.f32 %v943_v24 }
 0x315   : > { %v961_v28 = vpack.c.bf16 %v1446_v25, %v1448_v27  ;;  %1459 = vpow2.f32 %v941_v26 }
 0x316   : > { %v1450_v29 = vpop.eup %1449 }
 0x317   : > { %v1452_v30 = vpop.eup %1451  ;;  %v950_v31 = vadd.f32 1.0, %v1450_v29  ;;  %1256 = vmatmul.mubr.msk.bf16.vlgmr.msra.gmra.mrb[16].mxu1 %vm605_vm2, %v961_v28 }
 0x318   : > { %v949_v32 = vadd.f32 1.0, %v1452_v30  ;;  %1055 = vmatprep.mubr.bf16.mxu1 %v1477_v1 }
 0x319   : > { %1461 = vrcp.f32 %v950_v31 }
 0x31a   : > { %1463 = vrcp.f32 %v949_v32 }
 0x31b   : > { %v1454_v33 = vpop.eup %1453 }
 0x31c   : > { %v1456_v34 = vpop.eup %1455 }
 0x31d   : > { %v962_v35 = vpack.c.bf16 %v1454_v33, %v1456_v34 }
 0x31e   : > { %v1458_v36 = vpop.eup %1457 }
 0x31f   : > { %v1460_v37 = vpop.eup %1459  ;;  %v952_v38 = vadd.f32 1.0, %v1458_v36  ;;  %1257 = vmatmul.mubr.msk.bf16.gmra.mrb[20].mxu1 %vm605_vm2, %v962_v35 }
 0x320   : > { %v951_v39 = vadd.f32 1.0, %v1460_v37  ;;  %1065 = vmatprep.mubr.bf16.mxu1 %v1477_v1 }
 0x321   : > { %1465 = vrcp.f32 %v952_v38 }
 0x322   : > { %1467 = vrcp.f32 %v951_v39 }
 0x323   : > { %v1462_v40 = vpop.eup %1461 }
 0x324   : > { %v1464_v41 = vpop.eup %1463 }
 0x325   : > { %v963_v42 = vpack.c.bf16 %v1462_v40, %v1464_v41 }
 0x327   : > { %1258 = vmatmul.mubr.msk.bf16.gmra.mrb[24].mxu1 %vm605_vm2, %v963_v42 }
 0x328   : > { %1075 = vmatprep.mubr.bf16.mxu1 %v1477_v1 }
 0x32b   : > { %v1466_v43 = vpop.eup %1465 }
 0x32c   : > { %v1468_v44 = vpop.eup %1467 }
 0x32d   : > { %v964_v45 = vpack.c.bf16 %v1466_v43, %v1468_v44 }
 0x32f   : > { %1259 = vmatmul.mubr.msk.bf16.gmra.mrb[28].mxu1 %vm605_vm2, %v964_v45 }
 0x3ea   : > { %v1047_v53 = vpop.f32.mrb[16].mxu1 }
 0x3eb   : > { %v1048_v54 = vadd.f32 %v1047_v53, %v973_v51  ;;  %v1049_v1 = vpop.f32.mrb[17].mxu1 }
 0x3ec   : > { %v1050_v55 = vadd.f32 %v1049_v1, %v977_v52  ;;  %v1051_v56 = vpop.f32.mrb[18].mxu1 }
 0x3ed   : > { %v1052_v58 = vadd.f32 %v1051_v56, %v973_v51  ;;  %v1053_v59 = vpop.f32.mrb[19].mxu1 }
 0x3ee   : > { %v1272_v60 = vpack.c.bf16 %v1050_v55, %v1048_v54  ;;  %v1054_v61 = vadd.f32 %v1053_v59, %v977_v52 }
 0x3f0   : > { %1136 = vst.msk [vmem:[%s1692_s11] sm:$0xff] %vm1685_vm8, %v1272_v60  ;;  %v1273_v62 = vpack.c.bf16 %v1054_v61, %v1052_v58 }
 0x3f2   : > { %1137 = vst.msk [vmem:[%s1692_s11 + $0x8] sm:$0xff] %vm1685_vm8, %v1273_v62  ;;  %v1057_v63 = vpop.f32.mrb[20].mxu1 }
 0x3f3   : > { %v1058_v0 = vadd.f32 %v1057_v63, %v973_v51  ;;  %v1059_v2 = vpop.f32.mrb[21].mxu1 }
 0x3f4   : > { %v1060_v3 = vadd.f32 %v1059_v2, %v977_v52  ;;  %v1061_v4 = vpop.f32.mrb[22].mxu1 }
 0x3f5   : > { %v1062_v5 = vadd.f32 %v1061_v4, %v973_v51  ;;  %v1063_v6 = vpop.f32.mrb[23].mxu1 }
 0x3f6   : > { %v1274_v7 = vpack.c.bf16 %v1060_v3, %v1058_v0  ;;  %v1064_v8 = vadd.f32 %v1063_v6, %v977_v52 }
 0x3f8   : > { %1138 = vst.msk [vmem:[%s1692_s11 + $0x10] sm:$0xff] %vm1685_vm8, %v1274_v7  ;;  %v1275_v9 = vpack.c.bf16 %v1064_v8, %v1062_v5 }
 0x3fa   : > { %1139 = vst.msk [vmem:[%s1692_s11 + $0x18] sm:$0xff] %vm1685_vm8, %v1275_v9  ;;  %v1067_v10 = vpop.f32.mrb[24].mxu1 }
 0x3fb   : > { %v1068_v11 = vadd.f32 %v1067_v10, %v973_v51  ;;  %v1069_v12 = vpop.f32.mrb[25].mxu1 }
 0x3fc   : > { %v1070_v13 = vadd.f32 %v1069_v12, %v977_v52  ;;  %v1071_v14 = vpop.f32.mrb[26].mxu1 }
 0x3fd   : > { %v1072_v15 = vadd.f32 %v1071_v14, %v973_v51  ;;  %v1073_v16 = vpop.f32.mrb[27].mxu1 }
 0x3fe   : > { %v1276_v17 = vpack.c.bf16 %v1070_v13, %v1068_v11  ;;  %v1074_v18 = vadd.f32 %v1073_v16, %v977_v52 }
 0x400   : > { %1140 = vst.msk [vmem:[%s1692_s11 + $0x20] sm:$0xff] %vm1685_vm8, %v1276_v17  ;;  %v1277_v19 = vpack.c.bf16 %v1074_v18, %v1072_v15 }
 0x402   : > { %1141 = vst.msk [vmem:[%s1692_s11 + $0x28] sm:$0xff] %vm1685_vm8, %v1277_v19  ;;  %v1077_v20 = vpop.f32.mrb[28].mxu1 }
 0x403   : > { %v1078_v21 = vadd.f32 %v1077_v20, %v973_v51  ;;  %v1079_v22 = vpop.f32.mrb[29].mxu1 }
 0x404   : > { %v1080_v23 = vadd.f32 %v1079_v22, %v977_v52  ;;  %v1081_v24 = vpop.f32.mrb[30].mxu1 }
 0x405   : > { %v1082_v25 = vadd.f32 %v1081_v24, %v973_v51  ;;  %v1083_v26 = vpop.f32.mrb[31].mxu1 }
 0x406   : > { %v1278_v27 = vpack.c.bf16 %v1080_v23, %v1078_v21  ;;  %v1084_v28 = vadd.f32 %v1083_v26, %v977_v52 }
 0x408   : > { %1142 = vst.msk [vmem:[%s1692_s11 + $0x30] sm:$0xff] %vm1685_vm8, %v1278_v27  ;;  %v1279_v29 = vpack.c.bf16 %v1084_v28, %v1082_v25 }
 0x40a   : > { %1143 = vst.msk [vmem:[%s1692_s11 + $0x38] sm:$0xff] %vm1685_vm8, %v1279_v29 }
 0x40b PF: > { %s19_s30 = sadd.s32 1, %s1475_s30  }
 0x40c   : > { %p16_p4 = scmp.ge.s32.totalorder %s19_s30, 10  }
 0x40e   :  { %18 = sbr.rel (!%p16_p4) target bundleno = 1 (0x1), region = 86 }

</bundles_post_ra>
